<compile_context>
chip_gen: v6e
topology: v6e:2x2x1
jax: 0.10.0
libtpu: 0.0.40
codegen_flags: <defaults>
</compile_context>

<pallas_src>
from functools import partial

import jax
import jax.numpy as jnp
from jax.experimental import pallas as pl
from jax.experimental.pallas import tpu as pltpu

_TILE_BYTES = 4 * 1024 * 1024   # target bytes per pipeline buffer (per tile)
_PAD_LANE = 512                 # lane width used only on the (rare) pad path


def _copy_kernel(x_ref, o_ref):
    # Elementwise passthrough on the current VMEM tile.  Subclasses replace
    # this body with real compute; the tiling/pipelining skeleton stays.
    o_ref[...] = x_ref[...]


def _sublane_multiple(dtype) -> int:
    """Native sublane tile for this dtype: 8 (f32), 16 (bf16), 32 (int8/fp8)."""
    itemsize = jnp.dtype(dtype).itemsize
    return max(8, 32 // itemsize)


@partial(jax.jit, static_argnames=("debug",))
def base_layer_forward(x: jax.Array, debug: bool = False) -> jax.Array:
    """Pallas implementation of the BaseLayer.forward contract (identity).

    Args:
        x: input tensor (any shape, e.g. NCHW).
        debug: unused flag carried over from the PyTorch module.

    Returns:
        Tensor with identical shape/dtype/values to `x` (non-destructive).
    """
    if x.size == 0:
        return x

    orig_shape = x.shape
    total = x.size
    dtype = x.dtype
    itemsize = jnp.dtype(dtype).itemsize
    sub = _sublane_multiple(dtype)

    # --- choose a lane-dense layout -------------------------------------
    # Prefer a lane width that divides the element count exactly: no pad, no
    # trailing slice, unmasked full-lane stores.
    lane = None
    for cand in (512, 256, 128):
        if total % cand == 0:
            lane = cand
            break
    if lane is None:
        lane = _PAD_LANE
        padded_total = pl.cdiv(total, lane) * lane
    else:
        padded_total = total

    rows = padded_total // lane

    # --- constant-byte tiles across dtypes -------------------------------
    # ~4 MiB per buffer, rounded down to the dtype's sublane multiple.  Small
    # inputs use a single full-extent block (grid of 1).
    cap = max(sub, (_TILE_BYTES // (lane * itemsize)) // sub * sub)
    tile_r = rows if rows <= cap else cap

    flat = x.reshape(-1)
    if padded_total != total:
        # Rare path: element count not a multiple of 128.
        flat = jnp.pad(flat, (0, padded_total - total))
    x2d = flat.reshape(rows, lane)

    grid = (pl.cdiv(rows, tile_r),)   # ragged last block is masked by Pallas

    out2d = pl.pallas_call(
        _copy_kernel,
        out_shape=jax.ShapeDtypeStruct((rows, lane), dtype),
        grid=grid,
        in_specs=[pl.BlockSpec((tile_r, lane), lambda i: (i, 0))],
        out_specs=pl.BlockSpec((tile_r, lane), lambda i: (i, 0)),
        compiler_params=pltpu.CompilerParams(
            dimension_semantics=("parallel",),
            # 4 buffers x 4 MiB = 16 MiB; raise the scoped limit so v5e's
            # 16 MiB default is not hit exactly (harmless on v6e/v7x).
            vmem_limit_bytes=32 * 1024 * 1024,
        ),
    )(x2d)

    if padded_total != total:
        return out2d.reshape(-1)[:total].reshape(orig_shape)
    return out2d.reshape(orig_shape)


if __name__ == "__main__":
    key = jax.random.PRNGKey(0)

    # Small NCHW input consistent with a typical conv-style layer input.
    # total = 2048 elements -> no-pad fast path (lane=512, rows=4, grid=1).
    x = jax.random.normal(key, (2, 4, 16, 16), dtype=jnp.float32)
    y = base_layer_forward(x, debug=False)
    jax.block_until_ready(y)
    assert y.shape == x.shape
    assert y.dtype == x.dtype
    assert bool(jnp.array_equal(y, x))

    # Also exercise the ragged/pad path with a non-128-divisible bf16 input.
    x2 = jax.random.normal(jax.random.PRNGKey(0), (3, 5, 7), dtype=jnp.bfloat16)
    y2 = base_layer_forward(x2, debug=False)
    jax.block_until_ready(y2)
    assert y2.shape == x2.shape
    assert y2.dtype == x2.dtype
    assert bool(jnp.array_equal(y2, x2))

    print("KERNEL_OK")
</pallas_src>

<mosaic_0001>
module attributes {stable_mosaic.version = 11 : i64} {
  func.func @_copy_kernel(%arg0: i32, %arg1: memref<4x512xf32, #tpu.memory_space<vmem>>, %arg2: memref<4x512xf32, #tpu.memory_space<vmem>>) attributes {dimension_semantics = [#tpu.dimension_semantics<parallel>], iteration_bounds = array<i64: 1>, scalar_prefetch = 0 : i64, scratch_operands = 0 : i64, tpu.core_type = #tpu.core_type<tc>, window_params = [{transform_indices = @transform_0, window_bounds = array<i64: 4, 512>}, {transform_indices = @transform_1, window_bounds = array<i64: 4, 512>}]} {
    %c0 = arith.constant 0 : index
    %c0_0 = arith.constant 0 : index
    %0 = vector.load %arg1[%c0, %c0_0] : memref<4x512xf32, #tpu.memory_space<vmem>>, vector<4x512xf32>
    %c0_1 = arith.constant 0 : index
    %c0_2 = arith.constant 0 : index
    %1 = vector.load %arg2[%c0_1, %c0_2] : memref<4x512xf32, #tpu.memory_space<vmem>>, vector<4x512xf32>
    tpu.vector_store %arg2[%c0_1, %c0_2], %0 {strides = array<i32>} : memref<4x512xf32, #tpu.memory_space<vmem>>, vector<4x512xf32>,
    return
  }
  func.func @transform_0(%arg0: i32) -> (i32, i32) {
    %c0_i32 = arith.constant 0 : i32
    %c0_i32_0 = arith.constant 0 : i32
    return %arg0, %c0_i32 : i32, i32
  }
  func.func @transform_1(%arg0: i32) -> (i32, i32) {
    %c0_i32 = arith.constant 0 : i32
    %c0_i32_0 = arith.constant 0 : i32
    return %arg0, %c0_i32 : i32, i32
  }
}

</mosaic_0001>

<bundles_post_ra>
// kernel: base_layer_forward.1
= control target key start
LH: loop header
LB: loop body
LE: loop exit
PB: predicated region body
PF: predicated region fallthrough
CT: control target
= control target key end

     0   :  { %s38_s0 = inlined_call_operand.vmem [shape: f32[4,512], index: 0, kind: input, shape index: {}]   ;;  %s39_s1 = inlined_call_operand.vmem [shape: f32[4,512], index: 1, kind: output, shape index: {}]  }
   0x1   :  { %v8_v0 = vld [vmem:[%s38_s0] sm:$0xff]  ;;  %v9_v1 = vld [vmem:[%s38_s0 + $0x8] sm:$0xff] }
   0x2   :  { %10 = vst [vmem:[%s39_s1] sm:$0xff] %v8_v0  ;;  %11 = vst [vmem:[%s39_s1 + $0x8] sm:$0xff] %v9_v1 }

</bundles_post_ra>
